<compile_context>
chip_gen: v5e
topology: v5e:2x2
jax: 0.10.0
libtpu: 0.0.40
codegen_flags: <defaults>
</compile_context>

<pallas_src>
import functools

import jax
import jax.numpy as jnp
from jax.experimental import pallas as pl
from jax.experimental.pallas import tpu as pltpu

LANE = 128        # TPU lane width: pad every feature dimension to this
BIAS_ROWS = 8     # sublane-aligned strip under each weight block that holds the bias
TILE_B = 256      # batch rows per grid step (>=128 keeps MXU rows full)


def _make_mlp_kernel(n_layers):
    """Fused MLP kernel: n_layers x (matmul + bias + ReLU) on 128-lane padded tiles."""

    def kernel(x_ref, p_ref, o_ref):
        # x_ref: (TILE_B, 128)   p_ref: (n_layers, 136, 128)   o_ref: (TILE_B, 128)
        h = x_ref[...]
        for i in range(n_layers):
            w = p_ref[i, :LANE, :]                        # (128, 128) padded weight
            b = p_ref[i, LANE:LANE + BIAS_ROWS, :][0:1]   # (1, 128)   padded bias
            h = jnp.maximum(
                jnp.dot(h, w, preferred_element_type=jnp.float32) + b, 0.0)
        o_ref[...] = h

    return kernel


def init_params(key, inp_size, layers):
    """Deterministic init mirroring Net.init_model's layer sizes.

    Layer dims: inp_size -> layers[0] -> ... -> layers[-1] -> 1
    (PyTorch default Linear init is U(-1/sqrt(fan_in), 1/sqrt(fan_in)).)
    """
    dims = [inp_size] + list(layers) + [1]
    params = []
    for i in range(len(dims) - 1):
        fan_in, fan_out = dims[i], dims[i + 1]
        key, kw, kb = jax.random.split(key, 3)
        bound = 1.0 / (fan_in ** 0.5)
        w = jax.random.uniform(kw, (fan_in, fan_out), jnp.float32, -bound, bound)
        b = jax.random.uniform(kb, (fan_out,), jnp.float32, -bound, bound)
        params.append((w, b))
    return params


def pack_params(params):
    """Pack all (W, b) into one lane-padded slab (n_layers, 128+8, 128).

    Zero padding is semantics-preserving: padded lanes stay exactly 0 through
    matmul + bias + ReLU. Call once; reuse the slab across forward calls.
    """
    n_layers = len(params)
    slab = jnp.zeros((n_layers, LANE + BIAS_ROWS, LANE), jnp.float32)
    for i, (w, b) in enumerate(params):
        fi, fo = w.shape
        slab = slab.at[i, :fi, :fo].set(w.astype(jnp.float32))
        slab = slab.at[i, LANE, :fo].set(b.astype(jnp.float32))
    return slab


@functools.partial(jax.jit, static_argnames=("out_dim",))
def mlp_forward(x, param_slab, out_dim=1):
    """Fused forward pass: pads x to (B_pad, 128), runs the batch-tiled kernel,
    slices back to (batch, out_dim)."""
    n_layers = param_slab.shape[0]
    batch, feat = x.shape
    b_pad = pl.cdiv(batch, TILE_B) * TILE_B

    x_pad = jnp.zeros((b_pad, LANE), jnp.float32).at[:batch, :feat].set(
        x.astype(jnp.float32))

    out = pl.pallas_call(
        _make_mlp_kernel(n_layers),
        out_shape=jax.ShapeDtypeStruct((b_pad, LANE), jnp.float32),
        grid_spec=pltpu.PrefetchScalarGridSpec(
            num_scalar_prefetch=0,
            grid=(b_pad // TILE_B,),
            in_specs=[
                # batch tile of activations, pipelined across the grid
                pl.BlockSpec((TILE_B, LANE), lambda i: (i, 0)),
                # full parameter slab, constant index -> stays VMEM-resident
                pl.BlockSpec((n_layers, LANE + BIAS_ROWS, LANE),
                             lambda i: (0, 0, 0)),
            ],
            out_specs=pl.BlockSpec((TILE_B, LANE), lambda i: (i, 0)),
        ),
        compiler_params=pltpu.CompilerParams(
            dimension_semantics=("parallel",),   # shard batch tiles across v7x TCs
            vmem_limit_bytes=32 << 20,
        ),
    )(x_pad, param_slab)

    return out[:batch, :out_dim]


def reference_forward(x, params):
    h = x
    for w, b in params:
        h = jnp.maximum(h @ w + b, 0.0)
    return h


if __name__ == "__main__":
    # Net(learning_rate, gamma, eligibility_decay, inp_size=16, layers=[32, 32])
    inp_size = 16
    layers = [32, 32]
    batch = 512  # batch many states per call: at tiny batch the kernel is pure launch overhead

    key = jax.random.PRNGKey(0)
    key, kx = jax.random.split(key)
    x = jax.random.normal(kx, (batch, inp_size), jnp.float32)

    params = init_params(key, inp_size, layers)
    slab = pack_params(params)  # packed + padded once, reused every forward call

    out = mlp_forward(x, slab, out_dim=1)
    out = jax.block_until_ready(out)

    ref = reference_forward(x, params)
    assert out.shape == (batch, 1), out.shape
    assert jnp.allclose(out, ref, atol=1e-5, rtol=1e-5)

    print("KERNEL_OK")
</pallas_src>

<mosaic_0001>
module attributes {stable_mosaic.version = 11 : i64} {
  func.func @kernel(%arg0: i32, %arg1: memref<256x128xf32, #tpu.memory_space<vmem>>, %arg2: memref<3x136x128xf32, #tpu.memory_space<vmem>>, %arg3: memref<256x128xf32, #tpu.memory_space<vmem>>) attributes {dimension_semantics = [#tpu.dimension_semantics<parallel>], iteration_bounds = array<i64: 2>, scalar_prefetch = 0 : i64, scratch_operands = 0 : i64, tpu.core_type = #tpu.core_type<tc>, window_params = [{transform_indices = @transform_0, window_bounds = array<i64: 256, 128>}, {pipeline_mode = #tpu.pipeline_mode<synchronous>, transform_indices = @transform_1, window_bounds = array<i64: 3, 136, 128>}, {transform_indices = @transform_2, window_bounds = array<i64: 256, 128>}]} {
    %c0 = arith.constant 0 : index
    %c0_0 = arith.constant 0 : index
    %0 = vector.load %arg1[%c0, %c0_0] : memref<256x128xf32, #tpu.memory_space<vmem>>, vector<256x128xf32>
    %c0_1 = arith.constant 0 : index
    %c0_2 = arith.constant 0 : index
    %c0_3 = arith.constant 0 : index
    %1 = vector.load %arg2[%c0_1, %c0_2, %c0_3] : memref<3x136x128xf32, #tpu.memory_space<vmem>>, vector<1x128x128xf32>
    %2 = vector.shape_cast %1 : vector<1x128x128xf32> to vector<128x128xf32>
    %c0_4 = arith.constant 0 : index
    %c128 = arith.constant 128 : index
    %c0_5 = arith.constant 0 : index
    %3 = vector.load %arg2[%c0_4, %c128, %c0_5] : memref<3x136x128xf32, #tpu.memory_space<vmem>>, vector<1x8x128xf32>
    %4 = vector.shape_cast %3 : vector<1x8x128xf32> to vector<8x128xf32>
    %5 = vector.extract_strided_slice %4 {offsets = [0, 0], sizes = [1, 128], strides = [1, 1]} : vector<8x128xf32> to vector<1x128xf32>
    %cst = arith.constant dense<0.000000e+00> : vector<256x128xf32>
    %6 = tpu.matmul %0, %2, %cst {dimension_numbers = #tpu.dot_dimension_numbers<[1], [0], [0], [1], [0, 0, 1, 1], [], []>} : vector<256x128xf32>, vector<128x128xf32>, vector<256x128xf32> -> vector<256x128xf32>
    %7 = vector.broadcast %5 : vector<1x128xf32> to vector<256x128xf32>
    %8 = arith.addf %6, %7 : vector<256x128xf32>
    %cst_6 = arith.constant 0.000000e+00 : f32
    %9 = vector.broadcast %cst_6 : f32 to vector<256x128xf32>
    %10 = arith.maximumf %8, %9 : vector<256x128xf32>
    %c1 = arith.constant 1 : index
    %c0_7 = arith.constant 0 : index
    %c0_8 = arith.constant 0 : index
    %11 = vector.load %arg2[%c1, %c0_7, %c0_8] : memref<3x136x128xf32, #tpu.memory_space<vmem>>, vector<1x128x128xf32>
    %12 = vector.shape_cast %11 : vector<1x128x128xf32> to vector<128x128xf32>
    %c1_9 = arith.constant 1 : index
    %c128_10 = arith.constant 128 : index
    %c0_11 = arith.constant 0 : index
    %13 = vector.load %arg2[%c1_9, %c128_10, %c0_11] : memref<3x136x128xf32, #tpu.memory_space<vmem>>, vector<1x8x128xf32>
    %14 = vector.shape_cast %13 : vector<1x8x128xf32> to vector<8x128xf32>
    %15 = vector.extract_strided_slice %14 {offsets = [0, 0], sizes = [1, 128], strides = [1, 1]} : vector<8x128xf32> to vector<1x128xf32>
    %cst_12 = arith.constant dense<0.000000e+00> : vector<256x128xf32>
    %16 = tpu.matmul %10, %12, %cst_12 {dimension_numbers = #tpu.dot_dimension_numbers<[1], [0], [0], [1], [0, 0, 1, 1], [], []>} : vector<256x128xf32>, vector<128x128xf32>, vector<256x128xf32> -> vector<256x128xf32>
    %17 = vector.broadcast %15 : vector<1x128xf32> to vector<256x128xf32>
    %18 = arith.addf %16, %17 : vector<256x128xf32>
    %cst_13 = arith.constant 0.000000e+00 : f32
    %19 = vector.broadcast %cst_13 : f32 to vector<256x128xf32>
    %20 = arith.maximumf %18, %19 : vector<256x128xf32>
    %c2 = arith.constant 2 : index
    %c0_14 = arith.constant 0 : index
    %c0_15 = arith.constant 0 : index
    %21 = vector.load %arg2[%c2, %c0_14, %c0_15] : memref<3x136x128xf32, #tpu.memory_space<vmem>>, vector<1x128x128xf32>
    %22 = vector.shape_cast %21 : vector<1x128x128xf32> to vector<128x128xf32>
    %c2_16 = arith.constant 2 : index
    %c128_17 = arith.constant 128 : index
    %c0_18 = arith.constant 0 : index
    %23 = vector.load %arg2[%c2_16, %c128_17, %c0_18] : memref<3x136x128xf32, #tpu.memory_space<vmem>>, vector<1x8x128xf32>
    %24 = vector.shape_cast %23 : vector<1x8x128xf32> to vector<8x128xf32>
    %25 = vector.extract_strided_slice %24 {offsets = [0, 0], sizes = [1, 128], strides = [1, 1]} : vector<8x128xf32> to vector<1x128xf32>
    %cst_19 = arith.constant dense<0.000000e+00> : vector<256x128xf32>
    %26 = tpu.matmul %20, %22, %cst_19 {dimension_numbers = #tpu.dot_dimension_numbers<[1], [0], [0], [1], [0, 0, 1, 1], [], []>} : vector<256x128xf32>, vector<128x128xf32>, vector<256x128xf32> -> vector<256x128xf32>
    %27 = vector.broadcast %25 : vector<1x128xf32> to vector<256x128xf32>
    %28 = arith.addf %26, %27 : vector<256x128xf32>
    %cst_20 = arith.constant 0.000000e+00 : f32
    %29 = vector.broadcast %cst_20 : f32 to vector<256x128xf32>
    %30 = arith.maximumf %28, %29 : vector<256x128xf32>
    %c0_21 = arith.constant 0 : index
    %c0_22 = arith.constant 0 : index
    %31 = vector.load %arg3[%c0_21, %c0_22] : memref<256x128xf32, #tpu.memory_space<vmem>>, vector<256x128xf32>
    tpu.vector_store %arg3[%c0_21, %c0_22], %30 {strides = array<i32>} : memref<256x128xf32, #tpu.memory_space<vmem>>, vector<256x128xf32>,
    return
  }
  func.func @transform_0(%arg0: i32) -> (i32, i32) {
    %c0_i32 = arith.constant 0 : i32
    %c0_i32_0 = arith.constant 0 : i32
    return %arg0, %c0_i32 : i32, i32
  }
  func.func @transform_1(%arg0: i32) -> (i32, i32, i32) {
    %c0_i32 = arith.constant 0 : i32
    %c0_i32_0 = arith.constant 0 : i32
    %c0_i32_1 = arith.constant 0 : i32
    %c0_i32_2 = arith.constant 0 : i32
    return %c0_i32, %c0_i32_0, %c0_i32_1 : i32, i32, i32
  }
  func.func @transform_2(%arg0: i32) -> (i32, i32) {
    %c0_i32 = arith.constant 0 : i32
    %c0_i32_0 = arith.constant 0 : i32
    return %arg0, %c0_i32 : i32, i32
  }
}

</mosaic_0001>

<bundles_post_ra>
// kernel: mlp_forward.1
= control target key start
LH: loop header
LB: loop body
LE: loop exit
PB: predicated region body
PF: predicated region fallthrough
CT: control target
= control target key end

     0   :  { %s882_s9 = smov 0   ;;  %s1229_s0 = inlined_call_operand.vmem [shape: f32[512,128], index: 0, kind: input, shape index: {}]   ;;  %s1230_s1 = inlined_call_operand.vmem [shape: f32[3,136,128], index: 1, kind: input, shape index: {}]   ;;  %s1231_s2 = inlined_call_operand.vmem [shape: f32[512,128], index: 2, kind: output, shape index: {}]  }
   0x1 LB: > { %s758_s10 = sadd.s32 4294967295, %s865_s9   ;;  %p762_p0 = scmp.ge.s32.totalorder %s865_s9, 1  ;;  %s865_s9 = sphi %s882_s9, %s12_s9  }
   0x2   : > { %p113_p1 = scmp.lt.s32.totalorder %s865_s9, 3 }
   0x4   : > { %p114_p2 = pnand %p762_p0, %p113_p1 }
   0x5   : > { %s763_s27 = sshll.u32 (!%p114_p2), %s758_s10, 5 }
   0x6   : > { %117 = sbr.rel (%p114_p2) target bundleno = 624 (0x270), region = 28  ;;  %p136_p3 = scmp.lt.s32.totalorder (!%p114_p2), %s763_s27, 63 }
   0xb   : > { %v194_v0 = vld [vmem:[%s1230_s1 + $0x78] sm:$0xff]  ;;  %v193_v1 = vld [vmem:[%s1230_s1 + $0x70] sm:$0xff]  ;;  %v192_v2 = vld [vmem:[%s1230_s1 + $0x68] sm:$0xff]  ;;  %s1233_s27 = smov (!%p136_p3, %s763_s27), 63 }
   0xc   : > { %197 = vmatpush.msra.mxu0 %v194_v0  ;;  %803 = vmatpush.msra.mxu3 %v194_v0  ;;  %v191_v3 = vld [vmem:[%s1230_s1 + $0x60] sm:$0xff]  ;;  %v190_v4 = vld [vmem:[%s1230_s1 + $0x58] sm:$0xff]  ;;  %v189_v5 = vld [vmem:[%s1230_s1 + $0x50] sm:$0xff]  ;;  %s764_s11 = sshll.u32 %s1233_s27, 3 }
   0xd   : > { %v188_v6 = vld [vmem:[%s1230_s1 + $0x48] sm:$0xff]  ;;  %v187_v7 = vld [vmem:[%s1230_s1 + $0x40] sm:$0xff]  ;;  %v186_v8 = vld [vmem:[%s1230_s1 + $0x38] sm:$0xff]  ;;  %s943_s18 = scalar_lea.vmem %s1229_s0, %s764_s11  ;;  %s1152_s19 = scalar_lea.vmem %s1231_s2, %s764_s11 }
   0xe   : > { %198 = vmatpush.msra.mxu0 %v193_v1  ;;  %804 = vmatpush.msra.mxu3 %v193_v1  ;;  %v185_v9 = vld [vmem:[%s1230_s1 + $0x30] sm:$0xff]  ;;  %v184_v10 = vld [vmem:[%s1230_s1 + $0x28] sm:$0xff]  ;;  %v183_v11 = vld [vmem:[%s1230_s1 + $0x20] sm:$0xff] }
   0xf   : > { %v182_v12 = vld [vmem:[%s1230_s1 + $0x18] sm:$0xff]  ;;  %v181_v13 = vld [vmem:[%s1230_s1 + $0x10] sm:$0xff]  ;;  %v180_v14 = vld [vmem:[%s1230_s1 + $0x8] sm:$0xff] }
  0x10   : > { %199 = vmatpush.msra.mxu0 %v192_v2  ;;  %805 = vmatpush.msra.mxu3 %v192_v2  ;;  %v179_v15 = vld [vmem:[%s1230_s1] sm:$0xff]  ;;  %v148_v17 = vld [vmem:[%s943_s18 + $0x8] sm:$0xff]  ;;  %v149_v18 = vld [vmem:[%s943_s18 + $0x10] sm:$0xff] }
  0x11   : > { %v147_v16 = vld [vmem:[%s943_s18] sm:$0xff]  ;;  %v150_v19 = vld [vmem:[%s943_s18 + $0x18] sm:$0xff]  ;;  %v152_v21 = vld [vmem:[%s943_s18 + $0x28] sm:$0xff] }
  0x12   : > { %200 = vmatpush.msra.mxu0 %v191_v3  ;;  %806 = vmatpush.msra.mxu3 %v191_v3  ;;  %v151_v20 = vld [vmem:[%s943_s18 + $0x20] sm:$0xff]  ;;  %v153_v22 = vld [vmem:[%s943_s18 + $0x30] sm:$0xff]  ;;  %v154_v23 = vld [vmem:[%s943_s18 + $0x38] sm:$0xff] }
  0x13   : > { %v155_v24 = vld [vmem:[%s943_s18 + $0x40] sm:$0xff]  ;;  %v781_v26 = vld [vmem:[%s1230_s1 + $0xf8] sm:$0xff]  ;;  %v780_v27 = vld [vmem:[%s1230_s1 + $0xf0] sm:$0xff] }
  0x14   : > { %201 = vmatpush.msra.mxu0 %v190_v4  ;;  %807 = vmatpush.msra.mxu3 %v190_v4  ;;  %v782_v25 = vld [vmem:[%s1230_s1 + $0x100] sm:$0xff]  ;;  %v156_v28 = vld [vmem:[%s943_s18 + $0x48] sm:$0xff]  ;;  %v777_v31 = vld [vmem:[%s1230_s1 + $0xd8] sm:$0xff] }
  0x15   : > { %361 = vmatpush.msra.mxu1 %v782_v25  ;;  %v779_v29 = vld [vmem:[%s1230_s1 + $0xe8] sm:$0xff]  ;;  %v778_v30 = vld [vmem:[%s1230_s1 + $0xe0] sm:$0xff]  ;;  %v776_v32 = vld [vmem:[%s1230_s1 + $0xd0] sm:$0xff] }
  0x16   : > { %202 = vmatpush.msra.mxu0 %v189_v5  ;;  %808 = vmatpush.msra.mxu3 %v189_v5  ;;  %v157_v33 = vld [vmem:[%s943_s18 + $0x50] sm:$0xff]  ;;  %v775_v34 = vld [vmem:[%s1230_s1 + $0xc8] sm:$0xff]  ;;  %v774_v35 = vld [vmem:[%s1230_s1 + $0xc0] sm:$0xff] }
  0x17   : > { %362 = vmatpush.msra.mxu1 %v781_v26  ;;  %v171_v36 = vld [vmem:[%s943_s18 + $0xc0] sm:$0xff]  ;;  %v773_v37 = vld [vmem:[%s1230_s1 + $0xb8] sm:$0xff]  ;;  %v772_v38 = vld [vmem:[%s1230_s1 + $0xb0] sm:$0xff] }
  0x18   : > { %203 = vmatpush.msra.mxu0 %v188_v6  ;;  %809 = vmatpush.msra.mxu3 %v188_v6  ;;  %v158_v39 = vld [vmem:[%s943_s18 + $0x58] sm:$0xff]  ;;  %v771_v40 = vld [vmem:[%s1230_s1 + $0xa8] sm:$0xff]  ;;  %v770_v41 = vld [vmem:[%s1230_s1 + $0xa0] sm:$0xff] }
  0x19   : > { %363 = vmatpush.msra.mxu1 %v780_v27  ;;  %v172_v42 = vld [vmem:[%s943_s18 + $0xc8] sm:$0xff]  ;;  %v769_v43 = vld [vmem:[%s1230_s1 + $0x98] sm:$0xff]  ;;  %v159_v44 = vld [vmem:[%s943_s18 + $0x60] sm:$0xff] }
  0x1a   : > { %204 = vmatpush.msra.mxu0 %v187_v7  ;;  %810 = vmatpush.msra.mxu3 %v187_v7  ;;  %v768_v45 = vld [vmem:[%s1230_s1 + $0x90] sm:$0xff]  ;;  %v767_v46 = vld [vmem:[%s1230_s1 + $0x88] sm:$0xff]  ;;  %v174_v49 = vld [vmem:[%s943_s18 + $0xd8] sm:$0xff] }
  0x1b   : > { %364 = vmatpush.msra.mxu1 %v779_v29  ;;  %v173_v47 = vld [vmem:[%s943_s18 + $0xd0] sm:$0xff]  ;;  %v160_v48 = vld [vmem:[%s943_s18 + $0x68] sm:$0xff]  ;;  %v175_v51 = vld [vmem:[%s943_s18 + $0xe0] sm:$0xff] }
  0x1c   : > { %205 = vmatpush.msra.mxu0 %v186_v8  ;;  %811 = vmatpush.msra.mxu3 %v186_v8  ;;  %v161_v50 = vld [vmem:[%s943_s18 + $0x70] sm:$0xff]  ;;  %v162_v52 = vld [vmem:[%s943_s18 + $0x78] sm:$0xff]  ;;  %v195_v53 = vld [vmem:[%s1230_s1 + $0x80] sm:$0xff] }
  0x1d   : > { %365 = vmatpush.msra.mxu1 %v778_v30  ;;  %v1020_v54 = vperm.slane %v195_v53, 0  ;;  %v176_v55 = vld [vmem:[%s943_s18 + $0xe8] sm:$0xff]  ;;  %v163_v57 = vld [vmem:[%s943_s18 + $0x80] sm:$0xff]  ;;  %v177_v60 = vld [vmem:[%s943_s18 + $0xf0] sm:$0xff] }
  0x1e   : > { %206 = vmatpush.msra.mxu0 %v185_v9  ;;  %812 = vmatpush.msra.mxu3 %v185_v9  ;;  %v164_v62 = vld [vmem:[%s943_s18 + $0x88] sm:$0xff]  ;;  %v178_v1 = vld [vmem:[%s943_s18 + $0xf8] sm:$0xff]  ;;  %v165_v3 = vld [vmem:[%s943_s18 + $0x90] sm:$0xff] }
  0x1f   : > { %366 = vmatpush.msra.mxu1 %v777_v31  ;;  %v166_v7 = vld [vmem:[%s943_s18 + $0x98] sm:$0xff]  ;;  %v787_v53 = vld [vmem:[%s1230_s1 + $0x128] sm:$0xff] }
  0x20   : > { %207 = vmatpush.msra.mxu0 %v184_v10  ;;  %813 = vmatpush.msra.mxu3 %v184_v10 }
  0x21   : > { %367 = vmatpush.msra.mxu1 %v776_v32 }
  0x22   : > { %208 = vmatpush.msra.mxu0 %v183_v11  ;;  %814 = vmatpush.msra.mxu3 %v183_v11  ;;  %v167_v11 = vld [vmem:[%s943_s18 + $0xa0] sm:$0xff] }
  0x23   : > { %368 = vmatpush.msra.mxu1 %v775_v34 }
  0x24   : > { %209 = vmatpush.msra.mxu0 %v182_v12  ;;  %815 = vmatpush.msra.mxu3 %v182_v12 }
  0x25   : > { %369 = vmatpush.msra.mxu1 %v774_v35 }
  0x26   : > { %210 = vmatpush.msra.mxu0 %v181_v13  ;;  %816 = vmatpush.msra.mxu3 %v181_v13 }
  0x27   : > { %370 = vmatpush.msra.mxu1 %v773_v37 }
  0x28   : > { %211 = vmatpush.msra.mxu0 %v180_v14  ;;  %817 = vmatpush.msra.mxu3 %v180_v14 }
  0x29   : > { %371 = vmatpush.msra.mxu1 %v772_v38 }
  0x2a   : > { %212 = vmatpush.msra.mxu0 %v179_v15  ;;  %818 = vmatpush.msra.mxu3 %v179_v15  ;;  %v168_v15 = vld [vmem:[%s943_s18 + $0xa8] sm:$0xff] }
  0x2b   : > { %213 = vmatmul.f32.vlgmr.msra.gmra.mxu0 %v147_v16  ;;  %285 = vmatmul.f32.vlgmr.msra.gmra.mxu3 %v171_v36  ;;  %v795_v36 = vld [vmem:[%s1230_s1 + $0x168] sm:$0xff] }
  0x2c   : > { %819 = vmatpush.msrb.mxu3 %v782_v25  ;;  %372 = vmatpush.msra.mxu1 %v771_v40 }
  0x2e   : > { %820 = vmatpush.msrb.mxu3 %v781_v26  ;;  %373 = vmatpush.msra.mxu1 %v770_v41 }
  0x30   : > { %821 = vmatpush.msrb.mxu3 %v780_v27  ;;  %374 = vmatpush.msra.mxu1 %v769_v43 }
  0x32   : > { %822 = vmatpush.msrb.mxu3 %v779_v29  ;;  %375 = vmatpush.msra.mxu1 %v768_v45  ;;  %v799_v29 = vld [vmem:[%s1230_s1 + $0x188] sm:$0xff] }
  0x33   : > { %216 = vmatmul.f32.gmra.mxu0 %v148_v17  ;;  %288 = vmatmul.f32.gmra.mxu3 %v172_v42  ;;  %v792_v42 = vld [vmem:[%s1230_s1 + $0x150] sm:$0xff] }
  0x34   : > { %823 = vmatpush.msrb.mxu3 %v778_v30  ;;  %376 = vmatpush.msra.mxu1 %v767_v46 }
  0x35   : > { %525 = vmatpush.msra.mxu2 %v799_v29 }
  0x36   : > { %824 = vmatpush.msrb.mxu3 %v777_v31 }
  0x38   : > { %825 = vmatpush.msrb.mxu3 %v776_v32  ;;  %v798_v32 = vld [vmem:[%s1230_s1 + $0x180] sm:$0xff] }
  0x39   : > { %526 = vmatpush.msra.mxu2 %v798_v32 }
  0x3a   : > { %826 = vmatpush.msrb.mxu3 %v775_v34  ;;  %v797_v34 = vld [vmem:[%s1230_s1 + $0x178] sm:$0xff] }
  0x3b   : > { %219 = vmatmul.f32.gmra.mxu0 %v149_v18  ;;  %291 = vmatmul.f32.gmra.mxu3 %v173_v47 }
  0x3c   : > { %827 = vmatpush.msrb.mxu3 %v774_v35  ;;  %527 = vmatpush.msra.mxu2 %v797_v34  ;;  %v796_v35 = vld [vmem:[%s1230_s1 + $0x170] sm:$0xff] }
  0x3e   : > { %828 = vmatpush.msrb.mxu3 %v773_v37  ;;  %528 = vmatpush.msra.mxu2 %v796_v35 }
  0x40   : > { %829 = vmatpush.msrb.mxu3 %v772_v38  ;;  %529 = vmatpush.msra.mxu2 %v795_v36 }
  0x42   : > { %830 = vmatpush.msrb.mxu3 %v771_v40 }
  0x43   : > { %222 = vmatmul.f32.gmra.mxu0 %v150_v19  ;;  %294 = vmatmul.f32.gmra.mxu3 %v174_v49  ;;  %v169_v19 = vld [vmem:[%s943_s18 + $0xb0] sm:$0xff] }
  0x44   : > { %831 = vmatpush.msrb.mxu3 %v770_v41  ;;  %v793_v41 = vld [vmem:[%s1230_s1 + $0x158] sm:$0xff] }
  0x46   : > { %832 = vmatpush.msrb.mxu3 %v769_v43  ;;  %v791_v43 = vld [vmem:[%s1230_s1 + $0x148] sm:$0xff] }
  0x48   : > { %833 = vmatpush.msrb.mxu3 %v768_v45 }
  0x4a   : > { %834 = vmatpush.msrb.mxu3 %v767_v46  ;;  %v790_v46 = vld [vmem:[%s1230_s1 + $0x140] sm:$0xff] }
  0x4b   : > { %225 = vmatmul.f32.gmra.mxu0 %v151_v20  ;;  %297 = vmatmul.f32.gmra.mxu3 %v175_v51 }
  0x4c   : > { %835 = vmatpush.msra.mxu3 %v799_v29 }
  0x4e   : > { %836 = vmatpush.msra.mxu3 %v798_v32 }
  0x50   : > { %837 = vmatpush.msra.mxu3 %v797_v34 }
  0x52   : > { %838 = vmatpush.msra.mxu3 %v796_v35 }
  0x53   : > { %228 = vmatmul.f32.gmra.mxu0 %v152_v21  ;;  %300 = vmatmul.f32.gmra.mxu3 %v176_v55 }
  0x54   : > { %839 = vmatpush.msra.mxu3 %v795_v36 }
  0x5b   : > { %231 = vmatmul.f32.gmra.mxu0 %v153_v22  ;;  %303 = vmatmul.f32.gmra.mxu3 %v177_v60 }
  0x63   : > { %234 = vmatmul.f32.gmra.mxu0 %v154_v23  ;;  %306 = vmatmul.f32.gmra.mxu3 %v178_v1  ;;  %v170_v23 = vld [vmem:[%s943_s18 + $0xb8] sm:$0xff] }
  0x6b   : > { %237 = vmatmul.f32.gmra.mxu0 %v155_v24 }
  0x73   : > { %240 = vmatmul.f32.gmra.mxu0 %v156_v28 }
  0x7b   : > { %243 = vmatmul.f32.gmra.mxu0 %v157_v33 }
  0x83   : > { %246 = vmatmul.f32.gmra.mxu0 %v158_v39  ;;  %v794_v39 = vld [vmem:[%s1230_s1 + $0x160] sm:$0xff] }
  0x84   : > { %530 = vmatpush.msra.mxu2 %v794_v39  ;;  %840 = vmatpush.msra.mxu3 %v794_v39 }
  0x86   : > { %531 = vmatpush.msra.mxu2 %v793_v41  ;;  %841 = vmatpush.msra.mxu3 %v793_v41 }
  0x88   : > { %532 = vmatpush.msra.mxu2 %v792_v42  ;;  %842 = vmatpush.msra.mxu3 %v792_v42 }
  0x8a   : > { %533 = vmatpush.msra.mxu2 %v791_v43  ;;  %843 = vmatpush.msra.mxu3 %v791_v43 }
  0x8b   : > { %249 = vmatmul.f32.gmra.mxu0 %v159_v44 }
  0x8c   : > { %534 = vmatpush.msra.mxu2 %v790_v46  ;;  %844 = vmatpush.msra.mxu3 %v790_v46 }
  0x93   : > { %252 = vmatmul.f32.gmra.mxu0 %v160_v48 }
  0x9b   : > { %255 = vmatmul.f32.gmra.mxu0 %v161_v50  ;;  %v789_v50 = vld [vmem:[%s1230_s1 + $0x138] sm:$0xff] }
  0x9c   : > { %535 = vmatpush.msra.mxu2 %v789_v50  ;;  %845 = vmatpush.msra.mxu3 %v789_v50 }
  0xa3   : > { %258 = vmatmul.f32.gmra.mxu0 %v162_v52  ;;  %v788_v52 = vld [vmem:[%s1230_s1 + $0x130] sm:$0xff] }
  0xa4   : > { %536 = vmatpush.msra.mxu2 %v788_v52  ;;  %846 = vmatpush.msra.mxu3 %v788_v52 }
  0xa6   : > { %537 = vmatpush.msra.mxu2 %v787_v53  ;;  %847 = vmatpush.msra.mxu3 %v787_v53 }
  0xa8   : > { %v214_v56 = vpop.f32.mrf.mxu0 }
  0xa9   : > { %v215_v58 = vadd.f32 %v214_v56, %v1020_v54 }
  0xab   : > { %v310_v59 = vmax.f32 %v215_v58, 0.0  ;;  %261 = vmatmul.f32.gmra.mxu0 %v163_v57  ;;  %v786_v57 = vld [vmem:[%s1230_s1 + $0x120] sm:$0xff] }
  0xac   : > { %538 = vmatpush.msra.mxu2 %v786_v57  ;;  %848 = vmatpush.msra.mxu3 %v786_v57 }
  0xad   : > { %377 = vmatmul.f32.vlgmr.msra.gmra.mxu1 %v310_v59 }
  0xae   : > { %v286_v47 = vpop.f32.mrf.mxu3 }
  0xaf   : > { %v287_v49 = vadd.f32 %v286_v47, %v1020_v54 }
  0xb0   : > { %v217_v61 = vpop.f32.mrf.mxu0 }
  0xb1   : > { %v218_v63 = vadd.f32 %v217_v61, %v1020_v54  ;;  %v334_v51 = vmax.f32 %v287_v49, 0.0  ;;  %v785_v61 = vld [vmem:[%s1230_s1 + $0x118] sm:$0xff] }
  0xb2   : > { %539 = vmatpush.msra.mxu2 %v785_v61  ;;  %849 = vmatpush.msra.mxu3 %v785_v61 }
  0xb3   : > { %v311_v0 = vmax.f32 %v218_v63, 0.0  ;;  %264 = vmatmul.f32.gmra.mxu0 %v164_v62  ;;  %449 = vmatmul.f32.vlgmr.msrb.gmra.mxu3 %v334_v51  ;;  %v784_v63 = vld [vmem:[%s1230_s1 + $0x110] sm:$0xff] }
  0xb4   : > { %540 = vmatpush.msra.mxu2 %v784_v63  ;;  %850 = vmatpush.msra.mxu3 %v784_v63 }
  0xb5   : > { %380 = vmatmul.f32.gmra.mxu1 %v311_v0 }
  0xb6   : > { %v289_v58 = vpop.f32.mrf.mxu3 }
  0xb7   : > { %v290_v60 = vadd.f32 %v289_v58, %v1020_v54 }
  0xb8   : > { %v220_v2 = vpop.f32.mrf.mxu0 }
  0xb9   : > { %v221_v4 = vadd.f32 %v220_v2, %v1020_v54  ;;  %v335_v62 = vmax.f32 %v290_v60, 0.0 }
  0xbb   : > { %v312_v5 = vmax.f32 %v221_v4, 0.0  ;;  %267 = vmatmul.f32.gmra.mxu0 %v165_v3  ;;  %452 = vmatmul.f32.gmra.mxu3 %v335_v62 }
  0xbd   : > { %383 = vmatmul.f32.gmra.mxu1 %v312_v5 }
  0xbe   : > { %v292_v2 = vpop.f32.mrf.mxu3 }
  0xbf   : > { %v293_v4 = vadd.f32 %v292_v2, %v1020_v54 }
  0xc0   : > { %v223_v6 = vpop.f32.mrf.mxu0 }
  0xc1   : > { %v224_v8 = vadd.f32 %v223_v6, %v1020_v54  ;;  %v336_v5 = vmax.f32 %v293_v4, 0.0 }
  0xc3   : > { %v313_v9 = vmax.f32 %v224_v8, 0.0  ;;  %270 = vmatmul.f32.gmra.mxu0 %v166_v7  ;;  %455 = vmatmul.f32.gmra.mxu3 %v336_v5 }
  0xc5   : > { %386 = vmatmul.f32.gmra.mxu1 %v313_v9 }
  0xc6   : > { %v295_v8 = vpop.f32.mrf.mxu3 }
  0xc8   : > { %v226_v10 = vpop.f32.mrf.mxu0 }
  0xc9   : > { %v227_v12 = vadd.f32 %v226_v10, %v1020_v54  ;;  %v296_v10 = vadd.f32 %v295_v8, %v1020_v54 }
  0xcb   : > { %v314_v13 = vmax.f32 %v227_v12, 0.0  ;;  %273 = vmatmul.f32.gmra.mxu0 %v167_v11  ;;  %v337_v11 = vmax.f32 %v296_v10, 0.0 }
  0xcd   : > { %389 = vmatmul.f32.gmra.mxu1 %v314_v13  ;;  %458 = vmatmul.f32.gmra.mxu3 %v337_v11 }
  0xd0   : > { %v229_v14 = vpop.f32.mrf.mxu0 }
  0xd1   : > { %v230_v16 = vadd.f32 %v229_v14, %v1020_v54  ;;  %v298_v14 = vpop.f32.mrf.mxu3 }
  0xd3   : > { %v315_v17 = vmax.f32 %v230_v16, 0.0  ;;  %276 = vmatmul.f32.gmra.mxu0 %v168_v15  ;;  %v299_v16 = vadd.f32 %v298_v14, %v1020_v54 }
  0xd5   : > { %392 = vmatmul.f32.gmra.mxu1 %v315_v17  ;;  %v783_v17 = vld [vmem:[%s1230_s1 + $0x108] sm:$0xff] }
  0xd8   : > { %v232_v18 = vpop.f32.mrf.mxu0 }
  0xd9   : > { %v233_v20 = vadd.f32 %v232_v18, %v1020_v54  ;;  %v338_v18 = vmax.f32 %v299_v16, 0.0 }
  0xdb   : > { %v316_v21 = vmax.f32 %v233_v20, 0.0  ;;  %279 = vmatmul.f32.gmra.mxu0 %v169_v19  ;;  %v1105_v19 = vperm.slane %v783_v17, 0  ;;  %461 = vmatmul.f32.gmra.mxu3 %v338_v18 }
  0xdd   : > { %395 = vmatmul.f32.gmra.mxu1 %v316_v21 }
  0xe0   : > { %v235_v22 = vpop.f32.mrf.mxu0 }
  0xe1   : > { %v236_v24 = vadd.f32 %v235_v22, %v1020_v54 }
  0xe3   : > { %v317_v25 = vmax.f32 %v236_v24, 0.0  ;;  %282 = vmatmul.f32.gmra.mxu0 %v170_v23  ;;  %v301_v23 = vpop.f32.mrf.mxu3 }
  0xe5   : > { %398 = vmatmul.f32.gmra.mxu1 %v317_v25 }
  0xe8   : > { %v238_v26 = vpop.f32.mrf.mxu0 }
  0xe9   : > { %v239_v27 = vadd.f32 %v238_v26, %v1020_v54  ;;  %v302_v26 = vadd.f32 %v301_v23, %v1020_v54 }
  0xeb   : > { %v318_v28 = vmax.f32 %v239_v27, 0.0  ;;  %v304_v32 = vpop.f32.mrf.mxu3 }
  0xec   : > { %v305_v35 = vadd.f32 %v304_v32, %v1020_v54 }
  0xed   : > { %401 = vmatmul.f32.gmra.mxu1 %v318_v28  ;;  %v339_v28 = vmax.f32 %v302_v26, 0.0 }
  0xef   : > { %464 = vmatmul.f32.gmra.mxu3 %v339_v28 }
  0xf0   : > { %v241_v30 = vpop.f32.mrf.mxu0 }
  0xf1   : > { %v242_v31 = vadd.f32 %v241_v30, %v1020_v54 }
  0xf3   : > { %v319_v33 = vmax.f32 %v242_v31, 0.0  ;;  %v307_v41 = vpop.f32.mrf.mxu3 }
  0xf5   : > { %404 = vmatmul.f32.gmra.mxu1 %v319_v33 }
  0xf8   : > { %v244_v37 = vpop.f32.mrf.mxu0 }
  0xf9   : > { %v245_v38 = vadd.f32 %v244_v37, %v1020_v54  ;;  %v340_v37 = vmax.f32 %v305_v35, 0.0 }
  0xfb   : > { %v320_v40 = vmax.f32 %v245_v38, 0.0  ;;  %467 = vmatmul.f32.gmra.mxu3 %v340_v37 }
  0xfd   : > { %407 = vmatmul.f32.gmra.mxu1 %v320_v40 }
 0x100   : > { %v247_v44 = vpop.f32.mrf.mxu0 }
 0x101   : > { %v248_v45 = vadd.f32 %v247_v44, %v1020_v54  ;;  %v308_v44 = vadd.f32 %v307_v41, %v1020_v54 }
 0x103   : > { %v321_v48 = vmax.f32 %v248_v45, 0.0  ;;  %v341_v46 = vmax.f32 %v308_v44, 0.0 }
 0x105   : > { %410 = vmatmul.f32.gmra.mxu1 %v321_v48  ;;  %470 = vmatmul.f32.gmra.mxu3 %v341_v46 }
 0x108   : > { %v250_v55 = vpop.f32.mrf.mxu0 }
 0x109   : > { %v251_v56 = vadd.f32 %v250_v55, %v1020_v54 }
 0x10b   : > { %v322_v59 = vmax.f32 %v251_v56, 0.0 }
 0x10d   : > { %413 = vmatmul.f32.gmra.mxu1 %v322_v59 }
 0x110   : > { %v253_v0 = vpop.f32.mrf.mxu0 }
 0x111   : > { %v254_v1 = vadd.f32 %v253_v0, %v1020_v54 }
 0x113   : > { %v323_v3 = vmax.f32 %v254_v1, 0.0 }
 0x115   : > { %416 = vmatmul.f32.gmra.mxu1 %v323_v3 }
 0x118   : > { %v256_v6 = vpop.f32.mrf.mxu0 }
 0x119   : > { %v257_v7 = vadd.f32 %v256_v6, %v1020_v54 }
 0x11b   : > { %v324_v9 = vmax.f32 %v257_v7, 0.0 }
 0x11d   : > { %419 = vmatmul.f32.gmra.mxu1 %v324_v9 }
 0x120   : > { %v259_v12 = vpop.f32.mrf.mxu0 }
 0x121   : > { %v260_v13 = vadd.f32 %v259_v12, %v1020_v54 }
 0x123   : > { %v325_v15 = vmax.f32 %v260_v13, 0.0 }
 0x125   : > { %422 = vmatmul.f32.gmra.mxu1 %v325_v15 }
 0x128   : > { %v262_v20 = vpop.f32.mrf.mxu0 }
 0x129   : > { %v263_v21 = vadd.f32 %v262_v20, %v1020_v54 }
 0x12a   : > { %v378_v22 = vpop.f32.mrf.mxu1 }
 0x12b   : > { %v326_v24 = vmax.f32 %v263_v21, 0.0  ;;  %v379_v25 = vadd.f32 %v378_v22, %v1105_v19 }
 0x12d   : > { %v474_v27 = vmax.f32 %v379_v25, 0.0  ;;  %425 = vmatmul.f32.gmra.mxu1 %v326_v24 }
 0x12f   : > { %541 = vmatmul.f32.vlgmr.msra.gmra.mxu2 %v474_v27 }
 0x130   : > { %v265_v29 = vpop.f32.mrf.mxu0 }
 0x131   : > { %v266_v30 = vadd.f32 %v265_v29, %v1020_v54 }
 0x132   : > { %v381_v31 = vpop.f32.mrf.mxu1 }
 0x133   : > { %v327_v33 = vmax.f32 %v266_v30, 0.0  ;;  %v382_v34 = vadd.f32 %v381_v31, %v1105_v19 }
 0x135   : > { %v475_v36 = vmax.f32 %v382_v34, 0.0  ;;  %428 = vmatmul.f32.gmra.mxu1 %v327_v33 }
 0x136   : > { %v450_v27 = vpop.f32.mrf.mxu3 }
 0x137   : > { %544 = vmatmul.f32.gmra.mxu2 %v475_v36  ;;  %v451_v29 = vadd.f32 %v450_v27, %v1105_v19 }
 0x138   : > { %v268_v38 = vpop.f32.mrf.mxu0 }
 0x139   : > { %v269_v39 = vadd.f32 %v268_v38, %v1020_v54  ;;  %v498_v31 = vmax.f32 %v451_v29, 0.0 }
 0x13a   : > { %v384_v40 = vpop.f32.mrf.mxu1 }
 0x13b   : > { %v328_v42 = vmax.f32 %v269_v39, 0.0  ;;  %v385_v43 = vadd.f32 %v384_v40, %v1105_v19  ;;  %613 = vmatmul.f32.vlgmr.msra.gmra.mxu3 %v498_v31 }
 0x13d   : > { %v476_v45 = vmax.f32 %v385_v43, 0.0  ;;  %431 = vmatmul.f32.gmra.mxu1 %v328_v42 }
 0x13e   : > { %v453_v33 = vpop.f32.mrf.mxu3 }
 0x13f   : > { %547 = vmatmul.f32.gmra.mxu2 %v476_v45  ;;  %v454_v35 = vadd.f32 %v453_v33, %v1105_v19 }
 0x140   : > { %v271_v47 = vpop.f32.mrf.mxu0 }
 0x141   : > { %v272_v48 = vadd.f32 %v271_v47, %v1020_v54  ;;  %v499_v37 = vmax.f32 %v454_v35, 0.0 }
 0x142   : > { %v387_v49 = vpop.f32.mrf.mxu1 }
 0x143   : > { %v329_v50 = vmax.f32 %v272_v48, 0.0  ;;  %v388_v51 = vadd.f32 %v387_v49, %v1105_v19  ;;  %616 = vmatmul.f32.gmra.mxu3 %v499_v37 }
 0x145   : > { %v477_v52 = vmax.f32 %v388_v51, 0.0  ;;  %434 = vmatmul.f32.gmra.mxu1 %v329_v50 }
 0x146   : > { %v456_v39 = vpop.f32.mrf.mxu3 }
 0x147   : > { %550 = vmatmul.f32.gmra.mxu2 %v477_v52  ;;  %v457_v41 = vadd.f32 %v456_v39, %v1105_v19 }
 0x148   : > { %v274_v53 = vpop.f32.mrf.mxu0 }
 0x149   : > { %v275_v55 = vadd.f32 %v274_v53, %v1020_v54  ;;  %v500_v43 = vmax.f32 %v457_v41, 0.0 }
 0x14a   : > { %v390_v56 = vpop.f32.mrf.mxu1 }
 0x14b   : > { %v330_v57 = vmax.f32 %v275_v55, 0.0  ;;  %v391_v58 = vadd.f32 %v390_v56, %v1105_v19  ;;  %619 = vmatmul.f32.gmra.mxu3 %v500_v43  ;;  %v800_v55 = vld [vmem:[%s1230_s1 + $0x190] sm:$0xff] }
 0x14d   : > { %v478_v59 = vmax.f32 %v391_v58, 0.0  ;;  %437 = vmatmul.f32.gmra.mxu1 %v330_v57  ;;  %v1143_v58 = vperm.slane %v800_v55, 0 }
 0x14f   : > { %553 = vmatmul.f32.gmra.mxu2 %v478_v59 }
 0x150   : > { %v277_v60 = vpop.f32.mrf.mxu0  ;;  %v459_v45 = vpop.f32.mrf.mxu3 }
 0x151   : > { %v278_v61 = vadd.f32 %v277_v60, %v1020_v54  ;;  %v460_v47 = vadd.f32 %v459_v45, %v1105_v19 }
 0x152   : > { %v393_v62 = vpop.f32.mrf.mxu1 }
 0x153   : > { %v331_v63 = vmax.f32 %v278_v61, 0.0  ;;  %v394_v0 = vadd.f32 %v393_v62, %v1105_v19  ;;  %v501_v49 = vmax.f32 %v460_v47, 0.0 }
 0x155   : > { %v479_v1 = vmax.f32 %v394_v0, 0.0  ;;  %440 = vmatmul.f32.gmra.mxu1 %v331_v63  ;;  %622 = vmatmul.f32.gmra.mxu3 %v501_v49 }
 0x157   : > { %556 = vmatmul.f32.gmra.mxu2 %v479_v1 }
 0x158   : > { %v280_v2 = vpop.f32.mrf.mxu0 }
 0x159   : > { %v281_v3 = vadd.f32 %v280_v2, %v1020_v54 }
 0x15a   : > { %v396_v4 = vpop.f32.mrf.mxu1 }
 0x15b   : > { %v332_v5 = vmax.f32 %v281_v3, 0.0  ;;  %v397_v6 = vadd.f32 %v396_v4, %v1105_v19 }
 0x15d   : > { %v480_v7 = vmax.f32 %v397_v6, 0.0  ;;  %443 = vmatmul.f32.gmra.mxu1 %v332_v5 }
 0x15e   : > { %v462_v51 = vpop.f32.mrf.mxu3 }
 0x15f   : > { %559 = vmatmul.f32.gmra.mxu2 %v480_v7  ;;  %v463_v53 = vadd.f32 %v462_v51, %v1105_v19 }
 0x160   : > { %v283_v8 = vpop.f32.mrf.mxu0 }
 0x161   : > { %v284_v9 = vadd.f32 %v283_v8, %v1020_v54  ;;  %v502_v57 = vmax.f32 %v463_v53, 0.0 }
 0x162   : > { %v399_v10 = vpop.f32.mrf.mxu1 }
 0x163   : > { %v333_v11 = vmax.f32 %v284_v9, 0.0  ;;  %v400_v12 = vadd.f32 %v399_v10, %v1105_v19  ;;  %625 = vmatmul.f32.gmra.mxu3 %v502_v57 }
 0x165   : > { %v481_v13 = vmax.f32 %v400_v12, 0.0  ;;  %446 = vmatmul.f32.gmra.mxu1 %v333_v11 }
 0x167   : > { %562 = vmatmul.f32.gmra.mxu2 %v481_v13 }
 0x16a   : > { %v402_v14 = vpop.f32.mrf.mxu1 }
 0x16b   : > { %v403_v15 = vadd.f32 %v402_v14, %v1105_v19 }
 0x16d   : > { %v482_v16 = vmax.f32 %v403_v15, 0.0 }
 0x16f   : > { %565 = vmatmul.f32.gmra.mxu2 %v482_v16 }
 0x172   : > { %v405_v17 = vpop.f32.mrf.mxu1  ;;  %v465_v63 = vpop.f32.mrf.mxu3 }
 0x173   : > { %v406_v18 = vadd.f32 %v405_v17, %v1105_v19  ;;  %v466_v0 = vadd.f32 %v465_v63, %v1105_v19 }
 0x175   : > { %v483_v20 = vmax.f32 %v406_v18, 0.0  ;;  %v503_v3 = vmax.f32 %v466_v0, 0.0 }
 0x177   : > { %568 = vmatmul.f32.gmra.mxu2 %v483_v20  ;;  %628 = vmatmul.f32.gmra.mxu3 %v503_v3 }
 0x17a   : > { %v408_v21 = vpop.f32.mrf.mxu1 }
 0x17b   : > { %v409_v54 = vadd.f32 %v408_v21, %v1105_v19 }
 0x17d   : > { %v484_v22 = vmax.f32 %v409_v54, 0.0 }
 0x17e   : > { %v468_v8 = vpop.f32.mrf.mxu3 }
 0x17f   : > { %571 = vmatmul.f32.gmra.mxu2 %v484_v22  ;;  %v469_v9 = vadd.f32 %v468_v8, %v1105_v19 }
 0x181   : > { %v504_v12 = vmax.f32 %v469_v9, 0.0 }
 0x182   : > { %v411_v23 = vpop.f32.mrf.mxu1 }
 0x183   : > { %v412_v24 = vadd.f32 %v411_v23, %v1105_v19  ;;  %631 = vmatmul.f32.gmra.mxu3 %v504_v12 }
 0x185   : > { %v485_v25 = vmax.f32 %v412_v24, 0.0 }
 0x187   : > { %574 = vmatmul.f32.gmra.mxu2 %v485_v25 }
 0x188   : > { %v471_v17 = vpop.f32.mrf.mxu3 }
 0x189   : > { %v472_v18 = vadd.f32 %v471_v17, %v1105_v19 }
 0x18a   : > { %v414_v26 = vpop.f32.mrf.mxu1 }
 0x18b   : > { %v415_v28 = vadd.f32 %v414_v26, %v1105_v19  ;;  %v505_v54 = vmax.f32 %v472_v18, 0.0 }
 0x18d   : > { %v486_v30 = vmax.f32 %v415_v28, 0.0  ;;  %634 = vmatmul.f32.gmra.mxu3 %v505_v54 }
 0x18f   : > { %577 = vmatmul.f32.gmra.mxu2 %v486_v30 }
 0x192   : > { %v417_v32 = vpop.f32.mrf.mxu1 }
 0x193   : > { %v418_v34 = vadd.f32 %v417_v32, %v1105_v19 }
 0x195   : > { %v487_v36 = vmax.f32 %v418_v34, 0.0 }
 0x197   : > { %580 = vmatmul.f32.gmra.mxu2 %v487_v36 }
 0x19a   : > { %v420_v38 = vpop.f32.mrf.mxu1 }
 0x19b   : > { %v421_v40 = vadd.f32 %v420_v38, %v1105_v19 }
 0x19d   : > { %v488_v42 = vmax.f32 %v421_v40, 0.0 }
 0x19f   : > { %583 = vmatmul.f32.gmra.mxu2 %v488_v42 }
 0x1a2   : > { %v423_v44 = vpop.f32.mrf.mxu1 }
 0x1a3   : > { %v424_v46 = vadd.f32 %v423_v44, %v1105_v19 }
 0x1a5   : > { %v489_v48 = vmax.f32 %v424_v46, 0.0 }
 0x1a7   : > { %586 = vmatmul.f32.gmra.mxu2 %v489_v48 }
 0x1aa   : > { %v426_v50 = vpop.f32.mrf.mxu1 }
 0x1ab   : > { %v427_v52 = vadd.f32 %v426_v50, %v1105_v19 }
 0x1ad   : > { %v490_v56 = vmax.f32 %v427_v52, 0.0 }
 0x1af   : > { %589 = vmatmul.f32.gmra.mxu2 %v490_v56 }
 0x1b2   : > { %v429_v59 = vpop.f32.mrf.mxu1  ;;  %v542_v60 = vpop.f32.mrf.mxu2 }
 0x1b3   : > { %v430_v61 = vadd.f32 %v429_v59, %v1105_v19  ;;  %v543_v62 = vadd.f32 %v542_v60, %v1143_v58 }
 0x1b5   : > { %v491_v1 = vmax.f32 %v430_v61, 0.0  ;;  %v638_v2 = vmax.f32 %v543_v62, 0.0 }
 0x1b7   : > { %670 = vst [vmem:[%s1152_s19] sm:$0xff] %v638_v2  ;;  %592 = vmatmul.f32.gmra.mxu2 %v491_v1 }
 0x1ba   : > { %v432_v4 = vpop.f32.mrf.mxu1  ;;  %v545_v5 = vpop.f32.mrf.mxu2 }
 0x1bb   : > { %v433_v6 = vadd.f32 %v432_v4, %v1105_v19  ;;  %v546_v7 = vadd.f32 %v545_v5, %v1143_v58 }
 0x1bd   : > { %v492_v10 = vmax.f32 %v433_v6, 0.0  ;;  %v639_v11 = vmax.f32 %v546_v7, 0.0 }
 0x1be   : > { %v614_v63 = vpop.f32.mrf.mxu3 }
 0x1bf   : > { %671 = vst [vmem:[%s1152_s19 + $0x8] sm:$0xff] %v639_v11  ;;  %595 = vmatmul.f32.gmra.mxu2 %v492_v10  ;;  %v615_v1 = vadd.f32 %v614_v63, %v1143_v58 }
 0x1c1   : > { %v662_v3 = vmax.f32 %v615_v1, 0.0 }
 0x1c2   : > { %v435_v13 = vpop.f32.mrf.mxu1  ;;  %v548_v14 = vpop.f32.mrf.mxu2 }
 0x1c3   : > { %v436_v15 = vadd.f32 %v435_v13, %v1105_v19  ;;  %v549_v16 = vadd.f32 %v548_v14, %v1143_v58  ;;  %694 = vst [vmem:[%s1152_s19 + $0xc0] sm:$0xff] %v662_v3 }
 0x1c5   : > { %v493_v20 = vmax.f32 %v436_v15, 0.0  ;;  %v640_v21 = vmax.f32 %v549_v16, 0.0 }
 0x1c6   : > { %v617_v5 = vpop.f32.mrf.mxu3 }
 0x1c7   : > { %672 = vst [vmem:[%s1152_s19 + $0x10] sm:$0xff] %v640_v21  ;;  %598 = vmatmul.f32.gmra.mxu2 %v493_v20  ;;  %v618_v7 = vadd.f32 %v617_v5, %v1143_v58 }
 0x1c9   : > { %v663_v9 = vmax.f32 %v618_v7, 0.0 }
 0x1ca   : > { %v438_v22 = vpop.f32.mrf.mxu1  ;;  %v551_v23 = vpop.f32.mrf.mxu2 }
 0x1cb   : > { %v439_v24 = vadd.f32 %v438_v22, %v1105_v19  ;;  %v552_v25 = vadd.f32 %v551_v23, %v1143_v58  ;;  %695 = vst [vmem:[%s1152_s19 + $0xc8] sm:$0xff] %v663_v9 }
 0x1cd   : > { %v494_v26 = vmax.f32 %v439_v24, 0.0  ;;  %v641_v27 = vmax.f32 %v552_v25, 0.0 }
 0x1ce   : > { %v620_v11 = vpop.f32.mrf.mxu3 }
 0x1cf   : > { %673 = vst [vmem:[%s1152_s19 + $0x18] sm:$0xff] %v641_v27  ;;  %601 = vmatmul.f32.gmra.mxu2 %v494_v26  ;;  %v621_v13 = vadd.f32 %v620_v11, %v1143_v58 }
 0x1d1   : > { %v664_v15 = vmax.f32 %v621_v13, 0.0 }
 0x1d2   : > { %v441_v28 = vpop.f32.mrf.mxu1  ;;  %v554_v29 = vpop.f32.mrf.mxu2 }
 0x1d3   : > { %v442_v30 = vadd.f32 %v441_v28, %v1105_v19  ;;  %v555_v31 = vadd.f32 %v554_v29, %v1143_v58  ;;  %696 = vst [vmem:[%s1152_s19 + $0xd0] sm:$0xff] %v664_v15 }
 0x1d5   : > { %v495_v32 = vmax.f32 %v442_v30, 0.0  ;;  %v642_v33 = vmax.f32 %v555_v31, 0.0 }
 0x1d7   : > { %674 = vst [vmem:[%s1152_s19 + $0x20] sm:$0xff] %v642_v33  ;;  %604 = vmatmul.f32.gmra.mxu2 %v495_v32 }
 0x1d8   : > { %v623_v17 = vpop.f32.mrf.mxu3 }
 0x1d9   : > { %v624_v20 = vadd.f32 %v623_v17, %v1143_v58 }
 0x1da   : > { %v444_v34 = vpop.f32.mrf.mxu1  ;;  %v557_v35 = vpop.f32.mrf.mxu2 }
 0x1db   : > { %v445_v36 = vadd.f32 %v444_v34, %v1105_v19  ;;  %v558_v37 = vadd.f32 %v557_v35, %v1143_v58  ;;  %v665_v54 = vmax.f32 %v624_v20, 0.0 }
 0x1dd   : > { %v496_v38 = vmax.f32 %v445_v36, 0.0  ;;  %v643_v39 = vmax.f32 %v558_v37, 0.0  ;;  %697 = vst [vmem:[%s1152_s19 + $0xd8] sm:$0xff] %v665_v54 }
 0x1df   : > { %675 = vst [vmem:[%s1152_s19 + $0x28] sm:$0xff] %v643_v39  ;;  %607 = vmatmul.f32.gmra.mxu2 %v496_v38 }
 0x1e2   : > { %v447_v40 = vpop.f32.mrf.mxu1  ;;  %v560_v41 = vpop.f32.mrf.mxu2 }
 0x1e3   : > { %v448_v42 = vadd.f32 %v447_v40, %v1105_v19  ;;  %v561_v43 = vadd.f32 %v560_v41, %v1143_v58 }
 0x1e5   : > { %v497_v44 = vmax.f32 %v448_v42, 0.0  ;;  %v644_v45 = vmax.f32 %v561_v43, 0.0 }
 0x1e6   : > { %v626_v23 = vpop.f32.mrf.mxu3 }
 0x1e7   : > { %676 = vst [vmem:[%s1152_s19 + $0x30] sm:$0xff] %v644_v45  ;;  %610 = vmatmul.f32.gmra.mxu2 %v497_v44  ;;  %v627_v25 = vadd.f32 %v626_v23, %v1143_v58 }
 0x1e9   : > { %v666_v27 = vmax.f32 %v627_v25, 0.0 }
 0x1ea   : > { %v563_v46 = vpop.f32.mrf.mxu2 }
 0x1eb   : > { %v564_v47 = vadd.f32 %v563_v46, %v1143_v58  ;;  %698 = vst [vmem:[%s1152_s19 + $0xe0] sm:$0xff] %v666_v27 }
 0x1ed   : > { %v645_v48 = vmax.f32 %v564_v47, 0.0 }
 0x1ef   : > { %677 = vst [vmem:[%s1152_s19 + $0x38] sm:$0xff] %v645_v48 }
 0x1f2   : > { %v566_v49 = vpop.f32.mrf.mxu2 }
 0x1f3   : > { %v567_v50 = vadd.f32 %v566_v49, %v1143_v58 }
 0x1f5   : > { %v646_v51 = vmax.f32 %v567_v50, 0.0 }
 0x1f7   : > { %678 = vst [vmem:[%s1152_s19 + $0x40] sm:$0xff] %v646_v51 }
 0x1fa   : > { %v569_v19 = vpop.f32.mrf.mxu2  ;;  %v629_v30 = vpop.f32.mrf.mxu3 }
 0x1fb   : > { %v570_v52 = vadd.f32 %v569_v19, %v1143_v58  ;;  %v630_v31 = vadd.f32 %v629_v30, %v1143_v58 }
 0x1fd   : > { %v647_v53 = vmax.f32 %v570_v52, 0.0  ;;  %v667_v33 = vmax.f32 %v630_v31, 0.0 }
 0x1ff   : > { %679 = vst [vmem:[%s1152_s19 + $0x48] sm:$0xff] %v647_v53 }
 0x200   : > { %699 = vst [vmem:[%s1152_s19 + $0xe8] sm:$0xff] %v667_v33 }
 0x202   : > { %v572_v55 = vpop.f32.mrf.mxu2 }
 0x203   : > { %v573_v56 = vadd.f32 %v572_v55, %v1143_v58 }
 0x205   : > { %v648_v57 = vmax.f32 %v573_v56, 0.0 }
 0x206   : > { %v632_v36 = vpop.f32.mrf.mxu3 }
 0x207   : > { %680 = vst [vmem:[%s1152_s19 + $0x50] sm:$0xff] %v648_v57  ;;  %v633_v37 = vadd.f32 %v632_v36, %v1143_v58 }
 0x209   : > { %v668_v39 = vmax.f32 %v633_v37, 0.0 }
 0x20a   : > { %v575_v59 = vpop.f32.mrf.mxu2 }
 0x20b   : > { %v576_v60 = vadd.f32 %v575_v59, %v1143_v58  ;;  %700 = vst [vmem:[%s1152_s19 + $0xf0] sm:$0xff] %v668_v39 }
 0x20d   : > { %v649_v61 = vmax.f32 %v576_v60, 0.0 }
 0x20f   : > { %681 = vst [vmem:[%s1152_s19 + $0x58] sm:$0xff] %v649_v61 }
 0x210   : > { %v635_v42 = vpop.f32.mrf.mxu3 }
 0x211   : > { %v636_v43 = vadd.f32 %v635_v42, %v1143_v58 }
 0x212   : > { %v578_v62 = vpop.f32.mrf.mxu2 }
 0x213   : > { %v579_v0 = vadd.f32 %v578_v62, %v1143_v58  ;;  %v669_v45 = vmax.f32 %v636_v43, 0.0 }
 0x215   : > { %v650_v2 = vmax.f32 %v579_v0, 0.0  ;;  %701 = vst [vmem:[%s1152_s19 + $0xf8] sm:$0xff] %v669_v45 }
 0x217   : > { %682 = vst [vmem:[%s1152_s19 + $0x60] sm:$0xff] %v650_v2 }
 0x21a   : > { %v581_v4 = vpop.f32.mrf.mxu2 }
 0x21b   : > { %v582_v6 = vadd.f32 %v581_v4, %v1143_v58 }
 0x21d   : > { %v651_v8 = vmax.f32 %v582_v6, 0.0 }
 0x21f   : > { %683 = vst [vmem:[%s1152_s19 + $0x68] sm:$0xff] %v651_v8 }
 0x222   : > { %v584_v10 = vpop.f32.mrf.mxu2 }
 0x223   : > { %v585_v12 = vadd.f32 %v584_v10, %v1143_v58 }
 0x225   : > { %v652_v14 = vmax.f32 %v585_v12, 0.0 }
 0x227   : > { %684 = vst [vmem:[%s1152_s19 + $0x70] sm:$0xff] %v652_v14 }
 0x22a   : > { %v587_v16 = vpop.f32.mrf.mxu2 }
 0x22b   : > { %v588_v18 = vadd.f32 %v587_v16, %v1143_v58 }
 0x22d   : > { %v653_v21 = vmax.f32 %v588_v18, 0.0 }
 0x22f   : > { %685 = vst [vmem:[%s1152_s19 + $0x78] sm:$0xff] %v653_v21 }
 0x232   : > { %v590_v22 = vpop.f32.mrf.mxu2 }
 0x233   : > { %v591_v24 = vadd.f32 %v590_v22, %v1143_v58 }
 0x235   : > { %v654_v26 = vmax.f32 %v591_v24, 0.0 }
 0x237   : > { %686 = vst [vmem:[%s1152_s19 + $0x80] sm:$0xff] %v654_v26 }
 0x23a   : > { %v593_v28 = vpop.f32.mrf.mxu2 }
 0x23b   : > { %v594_v29 = vadd.f32 %v593_v28, %v1143_v58 }
 0x23d   : > { %v655_v32 = vmax.f32 %v594_v29, 0.0 }
 0x23f   : > { %687 = vst [vmem:[%s1152_s19 + $0x88] sm:$0xff] %v655_v32 }
 0x242   : > { %v596_v34 = vpop.f32.mrf.mxu2 }
 0x243   : > { %v597_v35 = vadd.f32 %v596_v34, %v1143_v58 }
 0x245   : > { %v656_v38 = vmax.f32 %v597_v35, 0.0 }
 0x247   : > { %688 = vst [vmem:[%s1152_s19 + $0x90] sm:$0xff] %v656_v38 }
 0x24a   : > { %v599_v40 = vpop.f32.mrf.mxu2 }
 0x24b   : > { %v600_v41 = vadd.f32 %v599_v40, %v1143_v58 }
 0x24d   : > { %v657_v44 = vmax.f32 %v600_v41, 0.0 }
 0x24f   : > { %689 = vst [vmem:[%s1152_s19 + $0x98] sm:$0xff] %v657_v44 }
 0x252   : > { %v602_v46 = vpop.f32.mrf.mxu2 }
 0x253   : > { %v603_v47 = vadd.f32 %v602_v46, %v1143_v58 }
 0x255   : > { %v658_v48 = vmax.f32 %v603_v47, 0.0 }
 0x257   : > { %690 = vst [vmem:[%s1152_s19 + $0xa0] sm:$0xff] %v658_v48 }
 0x25a   : > { %v605_v49 = vpop.f32.mrf.mxu2 }
 0x25b   : > { %v606_v50 = vadd.f32 %v605_v49, %v1143_v58 }
 0x25d   : > { %v659_v51 = vmax.f32 %v606_v50, 0.0 }
 0x25f   : > { %691 = vst [vmem:[%s1152_s19 + $0xa8] sm:$0xff] %v659_v51 }
 0x262   : > { %v608_v19 = vpop.f32.mrf.mxu2 }
 0x263   : > { %v609_v52 = vadd.f32 %v608_v19, %v1143_v58 }
 0x265   : > { %v660_v53 = vmax.f32 %v609_v52, 0.0 }
 0x267   : > { %692 = vst [vmem:[%s1152_s19 + $0xb0] sm:$0xff] %v660_v53 }
 0x26a   : > { %v611_v55 = vpop.f32.mrf.mxu2 }
 0x26b   : > { %v612_v56 = vadd.f32 %v611_v55, %v1143_v58 }
 0x26d   : > { %v661_v57 = vmax.f32 %v612_v56, 0.0 }
 0x26f   : > { %693 = vst [vmem:[%s1152_s19 + $0xb8] sm:$0xff] %v661_v57 }
 0x270 PF: > { %s12_s9 = sadd.s32 1, %s865_s9  }
 0x271   : > { %p9_p4 = scmp.ge.s32.totalorder %s12_s9, 4  }
 0x273   :  { %11 = sbr.rel (!%p9_p4) target bundleno = 1 (0x1), region = 60 }

</bundles_post_ra>
